<compile_context>
chip_gen: v5e
topology: v5e:2x2
jax: 0.10.0
libtpu: 0.0.40
codegen_flags: <defaults>
</compile_context>

<pallas_src>
import functools

import jax
import jax.numpy as jnp
from jax.experimental import pallas as pl
from jax.experimental.pallas import tpu as pltpu


def _round_up(x, m):
    return ((x + m - 1) // m) * m


def _matmul_bias_kernel(x_ref, w_ref, b_ref, o_ref):
    # Single MXU matmul (bf16 inputs, f32 accumulate) + f32 bias add,
    # written straight to the lane-dense output block (unmasked stores).
    o_ref[...] = (
        jnp.dot(x_ref[...], w_ref[...], preferred_element_type=jnp.float32)
        + b_ref[...]
    ).astype(o_ref.dtype)


def _pick_out_pad(out_dim):
    # v5e MXU is 128x128 -> OUT_p=128 is a perfect fit for small heads and extra
    # padding beyond 128 would only add DMA bytes. Once the head grows, pad N to
    # the full 256-wide systolic array of v6e/v7x.
    if out_dim <= 128:
        return 128
    return _round_up(out_dim, 256)


def _pick_batch_tiling(batch):
    # Returns (padded batch, M tile).
    if batch <= 8:
        bp = _round_up(batch, 8)
        return bp, bp                 # grid=(1,): launch-latency bound, don't split
    if batch <= 256:
        bp = _round_up(batch, 16)
        return bp, bp // 2            # >=2 "parallel" steps so v7x's 2nd TC gets work
    tm = 512                          # large-batch tile: ~85% of HBM roofline
    return _round_up(batch, tm), tm


def fold_normalized_linear_params(mean, std, w, b, C, H, W):
    """Call-once parameter preparation (hoisted out of the per-forward path).

    Folds the per-channel normalization exactly into the linear layer:
      ((x - mean)/std) @ W + b
        == x @ (W * inv_std_per_feature[:, None]) + ((-mean*inv_std)_per_feature @ W + b)
    then pads to lane-dense tiles and casts the matmul operand to bf16.

    Assumes NCHW input flattened channel-major via reshape(B, C*H*W).
    Returns (w_p [F, OUT_p] bf16, b_p [1, OUT_p] f32, OUT).
    """
    F = C * H * W
    OUT = w.shape[1]
    OUT_p = _pick_out_pad(OUT)

    inv_std = (1.0 / std).astype(jnp.float32)                          # [C]
    scale_f = jnp.repeat(inv_std, H * W)                               # [F] channel-major
    shift_f = jnp.repeat(-mean.astype(jnp.float32) * inv_std, H * W)   # [F]
    w_f32 = w.astype(jnp.float32)
    w_eff = w_f32 * scale_f[:, None]                                   # [F, OUT]
    b_eff = shift_f @ w_f32 + b.astype(jnp.float32)                    # [OUT]

    w_p = jnp.pad(w_eff, ((0, 0), (0, OUT_p - OUT))).astype(jnp.bfloat16)
    b_p = jnp.pad(b_eff, (0, OUT_p - OUT)).reshape(1, OUT_p)           # keep f32
    return w_p, b_p, OUT


@functools.partial(jax.jit, static_argnames=("out_dim",))
def normalized_network_forward(x_nchw, w_p, b_p, out_dim):
    """Per-forward hot path of NormalizedNetwork (Linear base model).

    x_nchw: [B, C, H, W] f32; w_p: [F, OUT_p] bf16 (folded+padded);
    b_p: [1, OUT_p] f32 (folded+padded). Returns [B, out_dim] f32.
    """
    B = x_nchw.shape[0]
    F, OUT_p = w_p.shape

    B_p, tm = _pick_batch_tiling(B)
    x_flat = x_nchw.reshape(B, F)
    if B_p != B:
        x_flat = jnp.pad(x_flat, ((0, B_p - B), (0, 0)))
    x_p = x_flat.astype(jnp.bfloat16)

    # --- VMEM guard for the resident-weight strategy (matters on v7x:
    #     64 MiB physical / 32 MiB default scoped VMEM). ---
    w_bytes = F * OUT_p * 2                       # bf16 weights
    w_spec_kwargs = {}
    if 2 * w_bytes > (16 << 20):
        # Grid-invariant weights gain nothing from double buffering.
        w_spec_kwargs["pipeline_mode"] = pl.Buffered(1)
        w_buf = 1
    else:
        w_buf = 2
    # TODO(synk): for backbone-sized F*OUT that overflow VMEM even single-buffered,
    # fall back to a K-tiled "arbitrary" grid axis with an f32 VMEM accumulator.

    vmem_est = (
        2 * (tm * F * 2 + tm * OUT_p * 4)  # double-buffered x (bf16) + out (f32) tiles
        + w_buf * w_bytes                  # resident weights
        + 2 * OUT_p * 4                    # bias
    )
    vmem_limit = None
    if vmem_est > (24 << 20):
        vmem_limit = min(vmem_est + (2 << 20), 64 << 20)

    cost = pl.CostEstimate(
        flops=2 * B_p * F * OUT_p,
        transcendentals=0,
        bytes_accessed=2 * B_p * F + 2 * F * OUT_p + 4 * OUT_p + 4 * B_p * OUT_p,
    )

    out_p = pl.pallas_call(
        _matmul_bias_kernel,
        out_shape=jax.ShapeDtypeStruct((B_p, OUT_p), jnp.float32),
        grid=(B_p // tm,),
        in_specs=[
            pl.BlockSpec((tm, F), lambda i: (i, 0)),                      # x batch tile (bf16)
            pl.BlockSpec((F, OUT_p), lambda i: (0, 0), **w_spec_kwargs),  # folded weights (resident)
            pl.BlockSpec((1, OUT_p), lambda i: (0, 0)),                   # folded bias (f32)
        ],
        out_specs=pl.BlockSpec((tm, OUT_p), lambda i: (i, 0)),
        compiler_params=pltpu.CompilerParams(
            dimension_semantics=("parallel",),    # batch axis only
            vmem_limit_bytes=vmem_limit,
        ),
        cost_estimate=cost,
    )(x_p, w_p, b_p)

    return out_p[:B, :out_dim]


def reference_forward(x_nchw, mean, std, w, b):
    x_norm = (x_nchw - mean.reshape(1, -1, 1, 1)) / std.reshape(1, -1, 1, 1)
    B = x_nchw.shape[0]
    return x_norm.reshape(B, -1) @ w + b


if __name__ == "__main__":
    key = jax.random.PRNGKey(0)
    k_x, k_w, k_b = jax.random.split(key, 3)

    # CIFAR-like small shapes: batch=2, channels=3 (mean/std have 3 entries),
    # spatial=16x16, 10 output classes.
    B, C, H, W = 2, 3, 16, 16
    OUT = 10
    F = C * H * W

    x = jax.random.uniform(k_x, (B, C, H, W), dtype=jnp.float32)  # image in [0, 1]
    mean = jnp.array([0.4914, 0.4822, 0.4465], dtype=jnp.float32)
    std = jnp.array([0.2471, 0.2435, 0.2616], dtype=jnp.float32)

    # Deterministic synthetic base-model parameters (Linear F -> OUT).
    w = jax.random.normal(k_w, (F, OUT), dtype=jnp.float32) * 0.02
    b = jax.random.normal(k_b, (OUT,), dtype=jnp.float32) * 0.01

    # Call-once fold + pad (hoisted out of the forward path).
    w_p, b_p, out_dim = fold_normalized_linear_params(mean, std, w, b, C, H, W)
    w_p, b_p = jax.block_until_ready((w_p, b_p))

    out = normalized_network_forward(x, w_p, b_p, out_dim)
    out = jax.block_until_ready(out)

    ref = reference_forward(x, mean, std, w, b)
    assert out.shape == (B, OUT)
    # bf16 matmul inputs (f32 accumulate) -> relaxed tolerance vs f32 reference.
    assert jnp.all(jnp.isfinite(out)), "non-finite output"
    assert jnp.allclose(out, ref, atol=5e-2, rtol=5e-2), "mismatch vs reference"

    print("KERNEL_OK")
</pallas_src>

<mosaic_0001>
module attributes {stable_mosaic.version = 11 : i64} {
  func.func @_matmul_bias_kernel(%arg0: i32, %arg1: memref<8x768xbf16, #tpu.memory_space<vmem>>, %arg2: memref<768x128xbf16, #tpu.memory_space<vmem>>, %arg3: memref<1x128xf32, #tpu.memory_space<vmem>>, %arg4: memref<8x128xf32, #tpu.memory_space<vmem>>) attributes {dimension_semantics = [#tpu.dimension_semantics<parallel>], iteration_bounds = array<i64: 1>, scalar_prefetch = 0 : i64, scratch_operands = 0 : i64, tpu.core_type = #tpu.core_type<tc>, window_params = [{transform_indices = @transform_0, window_bounds = array<i64: 8, 768>}, {pipeline_mode = #tpu.pipeline_mode<synchronous>, transform_indices = @transform_1, window_bounds = array<i64: 768, 128>}, {pipeline_mode = #tpu.pipeline_mode<synchronous>, transform_indices = @transform_2, window_bounds = array<i64: 1, 128>}, {transform_indices = @transform_3, window_bounds = array<i64: 8, 128>}]} {
    %c0 = arith.constant 0 : index
    %c0_0 = arith.constant 0 : index
    %0 = vector.load %arg1[%c0, %c0_0] : memref<8x768xbf16, #tpu.memory_space<vmem>>, vector<8x768xbf16>
    %c0_1 = arith.constant 0 : index
    %c0_2 = arith.constant 0 : index
    %1 = vector.load %arg2[%c0_1, %c0_2] : memref<768x128xbf16, #tpu.memory_space<vmem>>, vector<768x128xbf16>
    %cst = arith.constant dense<0.000000e+00> : vector<8x128xf32>
    %2 = tpu.matmul %0, %1, %cst {dimension_numbers = #tpu.dot_dimension_numbers<[1], [0], [0], [1], [0, 0, 1, 1], [], []>} : vector<8x768xbf16>, vector<768x128xbf16>, vector<8x128xf32> -> vector<8x128xf32>
    %c0_3 = arith.constant 0 : index
    %c0_4 = arith.constant 0 : index
    %3 = vector.load %arg3[%c0_3, %c0_4] : memref<1x128xf32, #tpu.memory_space<vmem>>, vector<1x128xf32>
    %4 = vector.broadcast %3 : vector<1x128xf32> to vector<8x128xf32>
    %5 = arith.addf %2, %4 : vector<8x128xf32>
    %c0_5 = arith.constant 0 : index
    %c0_6 = arith.constant 0 : index
    %6 = vector.load %arg4[%c0_5, %c0_6] : memref<8x128xf32, #tpu.memory_space<vmem>>, vector<8x128xf32>
    tpu.vector_store %arg4[%c0_5, %c0_6], %5 {strides = array<i32>} : memref<8x128xf32, #tpu.memory_space<vmem>>, vector<8x128xf32>,
    return
  }
  func.func @transform_0(%arg0: i32) -> (i32, i32) {
    %c0_i32 = arith.constant 0 : i32
    %c0_i32_0 = arith.constant 0 : i32
    return %arg0, %c0_i32 : i32, i32
  }
  func.func @transform_1(%arg0: i32) -> (i32, i32) {
    %c0_i32 = arith.constant 0 : i32
    %c0_i32_0 = arith.constant 0 : i32
    %c0_i32_1 = arith.constant 0 : i32
    return %c0_i32, %c0_i32_0 : i32, i32
  }
  func.func @transform_2(%arg0: i32) -> (i32, i32) {
    %c0_i32 = arith.constant 0 : i32
    %c0_i32_0 = arith.constant 0 : i32
    %c0_i32_1 = arith.constant 0 : i32
    return %c0_i32, %c0_i32_0 : i32, i32
  }
  func.func @transform_3(%arg0: i32) -> (i32, i32) {
    %c0_i32 = arith.constant 0 : i32
    %c0_i32_0 = arith.constant 0 : i32
    return %arg0, %c0_i32 : i32, i32
  }
}

</mosaic_0001>

<bundles_post_ra>
// kernel: normalized_network_forward.1
= control target key start
LH: loop header
LB: loop body
LE: loop exit
PB: predicated region body
PF: predicated region fallthrough
CT: control target
= control target key end

     0   :  { %8 = vsyncpa [#allocation3], 0  ;;  %s796_s15 = smov [#allocation2]   ;;  %s797_s17 = smov 64   ;;  %s837_s0 = inlined_call_operand.vmem [shape: bf16[8,768], index: 0, kind: input, shape index: {}]   ;;  %s838_s1 = inlined_call_operand.hbm [shape: bf16[768,128], index: 1, kind: input, shape index: {}]   ;;  %s839_s2 = inlined_call_operand.vmem [shape: f32[1,128], index: 2, kind: input, shape index: {}]   ;;  %s840_s3 = inlined_call_operand.vmem [shape: f32[8,128], index: 3, kind: output, shape index: {}]  }
   0x1   :  { %s15_s14 = sshll.u32 %s838_s1, 4  ;;  %s17_s16 = sshll.u32 %s796_s15, 4  ;;  %s16_s14 = int_to_ptr.hbm [resolvable:$true] %s15_s14  ;;  %s18_s16 = int_to_ptr.vmem [resolvable:$true] %s17_s16 }
   0x2   :  { %s798_s18 = smov 4  }
   0x3   :  { %23 = dma.hbm_to_vmem [thread:$0]  %s16_s14, 6144, %s18_s16, [#allocation3], %s797_s17, %s797_s17, %s798_s18  }
   0x4   :  { %794 = dma.done.wait [#allocation3], 6144  }
   0x5   :  { %795 = vsyncadd [#allocation3], 4294961152  ;;  %v725_v0 = vld [vmem:[#allocation2 + $0x38] sm:$0xff]  ;;  %v724_v2 = vld [vmem:[#allocation2 + $0x30] sm:$0xff] }
   0x6   :  { %v733_v1 = vld [vmem:[#allocation2 + $0x78] sm:$0xff]  ;;  %442 = vmatpush.bf16.msra.mxu0 %v725_v0  ;;  %v732_v3 = vld [vmem:[#allocation2 + $0x70] sm:$0xff]  ;;  %v723_v8 = vld [vmem:[#allocation2 + $0x28] sm:$0xff] }
   0x7   :  { %455 = vmatpush.bf16.msra.mxu1 %v733_v1  ;;  %v741_v4 = vld [vmem:[#allocation2 + $0xb8] sm:$0xff]  ;;  %v740_v6 = vld [vmem:[#allocation2 + $0xb0] sm:$0xff]  ;;  %v731_v9 = vld [vmem:[#allocation2 + $0x68] sm:$0xff] }
   0x8   :  { %v749_v5 = vld [vmem:[#allocation2 + $0xf8] sm:$0xff]  ;;  %468 = vmatpush.bf16.msra.mxu2 %v741_v4  ;;  %v748_v7 = vld [vmem:[#allocation2 + $0xf0] sm:$0xff]  ;;  %v739_v10 = vld [vmem:[#allocation2 + $0xa8] sm:$0xff] }
   0x9   :  { %481 = vmatpush.bf16.msra.mxu3 %v749_v5  ;;  %v747_v11 = vld [vmem:[#allocation2 + $0xe8] sm:$0xff]  ;;  %v722_v12 = vld [vmem:[#allocation2 + $0x20] sm:$0xff]  ;;  %v721_v16 = vld [vmem:[#allocation2 + $0x18] sm:$0xff] }
   0xa   :  { %443 = vmatpush.bf16.msra.mxu0 %v724_v2  ;;  %v730_v13 = vld [vmem:[#allocation2 + $0x60] sm:$0xff]  ;;  %v729_v17 = vld [vmem:[#allocation2 + $0x58] sm:$0xff]  ;;  %v720_v20 = vld [vmem:[#allocation2 + $0x10] sm:$0xff] }
   0xb   :  { %456 = vmatpush.bf16.msra.mxu1 %v732_v3  ;;  %v738_v14 = vld [vmem:[#allocation2 + $0xa0] sm:$0xff]  ;;  %v737_v18 = vld [vmem:[#allocation2 + $0x98] sm:$0xff]  ;;  %v728_v21 = vld [vmem:[#allocation2 + $0x50] sm:$0xff] }
   0xc   :  { %469 = vmatpush.bf16.msra.mxu2 %v740_v6  ;;  %v746_v15 = vld [vmem:[#allocation2 + $0xe0] sm:$0xff]  ;;  %v745_v19 = vld [vmem:[#allocation2 + $0xd8] sm:$0xff]  ;;  %v736_v22 = vld [vmem:[#allocation2 + $0x90] sm:$0xff] }
   0xd   :  { %482 = vmatpush.bf16.msra.mxu3 %v748_v7  ;;  %v744_v23 = vld [vmem:[#allocation2 + $0xd0] sm:$0xff]  ;;  %v719_v24 = vld [vmem:[#allocation2 + $0x8] sm:$0xff]  ;;  %v30_v26 = vld [vmem:[%s837_s0] sm:$0xff] }
   0xe   :  { %444 = vmatpush.bf16.msra.mxu0 %v723_v8  ;;  %v727_v25 = vld [vmem:[#allocation2 + $0x48] sm:$0xff]  ;;  %v136_v29 = vunpack.c.l.b16 %v30_v26  ;;  %v137_v30 = vunpack.c.h.b16 %v30_v26  ;;  %v718_v32 = vld [vmem:[#allocation2] sm:$0xff]  ;;  %v757_v34 = vld [vmem:[#allocation2 + $0x138] sm:$0xff] }
   0xf   :  { %457 = vmatpush.bf16.msra.mxu1 %v731_v9  ;;  %v735_v27 = vld [vmem:[#allocation2 + $0x88] sm:$0xff]  ;;  %v726_v33 = vld [vmem:[#allocation2 + $0x40] sm:$0xff]  ;;  %v765_v35 = vld [vmem:[#allocation2 + $0x178] sm:$0xff] }
  0x10   :  { %470 = vmatpush.bf16.msra.mxu2 %v739_v10  ;;  %v743_v28 = vld [vmem:[#allocation2 + $0xc8] sm:$0xff]  ;;  %v734_v36 = vld [vmem:[#allocation2 + $0x80] sm:$0xff]  ;;  %v142_v40 = vpack.c.b16 %v136_v29, %v136_v29  ;;  %v143_v41 = vpack.c.b16 %v137_v30, %v137_v30  ;;  %v756_v42 = vld [vmem:[#allocation2 + $0x130] sm:$0xff] }
  0x11   :  { %483 = vmatpush.bf16.msra.mxu3 %v747_v11  ;;  %v31_v31 = vld [vmem:[%s837_s0 + $0x8] sm:$0xff]  ;;  %v742_v37 = vld [vmem:[#allocation2 + $0xc0] sm:$0xff]  ;;  %v764_v43 = vld [vmem:[#allocation2 + $0x170] sm:$0xff] }
  0x12   :  { %445 = vmatpush.bf16.msra.mxu0 %v722_v12  ;;  %v138_v38 = vunpack.c.l.b16 %v31_v31  ;;  %v139_v39 = vunpack.c.h.b16 %v31_v31  ;;  %v755_v46 = vld [vmem:[#allocation2 + $0x128] sm:$0xff]  ;;  %v754_v48 = vld [vmem:[#allocation2 + $0x120] sm:$0xff]  ;;  %v753_v50 = vld [vmem:[#allocation2 + $0x118] sm:$0xff] }
  0x13   :  { %458 = vmatpush.bf16.msra.mxu1 %v730_v13  ;;  %v763_v47 = vld [vmem:[#allocation2 + $0x168] sm:$0xff]  ;;  %v762_v49 = vld [vmem:[#allocation2 + $0x160] sm:$0xff]  ;;  %v761_v51 = vld [vmem:[#allocation2 + $0x158] sm:$0xff] }
  0x14   :  { %471 = vmatpush.bf16.msra.mxu2 %v738_v14  ;;  %v144_v44 = vpack.c.b16 %v138_v38, %v138_v38  ;;  %v145_v45 = vpack.c.b16 %v139_v39, %v139_v39  ;;  %v752_v52 = vld [vmem:[#allocation2 + $0x110] sm:$0xff]  ;;  %v751_v54 = vld [vmem:[#allocation2 + $0x108] sm:$0xff]  ;;  %v750_v59 = vld [vmem:[#allocation2 + $0x100] sm:$0xff] }
  0x15   :  { %484 = vmatpush.bf16.msra.mxu3 %v746_v15  ;;  %v760_v53 = vld [vmem:[#allocation2 + $0x150] sm:$0xff]  ;;  %v759_v55 = vld [vmem:[#allocation2 + $0x148] sm:$0xff]  ;;  %v758_v60 = vld [vmem:[#allocation2 + $0x140] sm:$0xff] }
  0x16   :  { %446 = vmatpush.bf16.msra.mxu0 %v721_v16  ;;  %v32_v56 = vld [vmem:[%s837_s0 + $0x10] sm:$0xff]  ;;  %v769_v5 = vld [vmem:[%s839_s2] ss:$0 sm:$0xff] }
  0x17   :  { %459 = vmatpush.bf16.msra.mxu1 %v729_v17  ;;  %v140_v57 = vunpack.c.l.b16 %v32_v56  ;;  %v141_v58 = vunpack.c.h.b16 %v32_v56 }
  0x18   :  { %472 = vmatpush.bf16.msra.mxu2 %v737_v18 }
  0x19   :  { %485 = vmatpush.bf16.msra.mxu3 %v745_v19  ;;  %v146_v61 = vpack.c.b16 %v140_v57, %v140_v57  ;;  %v147_v62 = vpack.c.b16 %v141_v58, %v141_v58 }
  0x1a   :  { %447 = vmatpush.bf16.msra.mxu0 %v720_v20 }
  0x1b   :  { %460 = vmatpush.bf16.msra.mxu1 %v728_v21 }
  0x1c   :  { %473 = vmatpush.bf16.msra.mxu2 %v736_v22 }
  0x1d   :  { %486 = vmatpush.bf16.msra.mxu3 %v744_v23 }
  0x1e   :  { %448 = vmatpush.bf16.msra.mxu0 %v719_v24 }
  0x1f   :  { %461 = vmatpush.bf16.msra.mxu1 %v727_v25 }
  0x20   :  { %474 = vmatpush.bf16.msra.mxu2 %v735_v27 }
  0x21   :  { %487 = vmatpush.bf16.msra.mxu3 %v743_v28 }
  0x22   :  { %449 = vmatpush.bf16.msra.mxu0 %v718_v32 }
  0x23   :  { %462 = vmatpush.bf16.msra.mxu1 %v726_v33 }
  0x24   :  { %475 = vmatpush.bf16.msra.mxu2 %v734_v36 }
  0x25   :  { %488 = vmatpush.bf16.msra.mxu3 %v742_v37  ;;  %450 = vmatmul.bf16.vlgmr.msra.gmra.mxu0 %v142_v40 }
  0x26   :  { %494 = vmatpush.bf16.msrb.mxu0 %v757_v34  ;;  %463 = vmatmul.bf16.vlgmr.msra.gmra.mxu1 %v143_v41 }
  0x27   :  { %507 = vmatpush.bf16.msrb.mxu1 %v765_v35  ;;  %476 = vmatmul.bf16.vlgmr.msra.gmra.mxu2 %v144_v44 }
  0x28   :  { %489 = vmatmul.bf16.vlgmr.msra.gmra.mxu3 %v145_v45 }
  0x2a   :  { %495 = vmatpush.bf16.msrb.mxu0 %v756_v42 }
  0x2b   :  { %508 = vmatpush.bf16.msrb.mxu1 %v764_v43 }
  0x2e   :  { %496 = vmatpush.bf16.msrb.mxu0 %v755_v46 }
  0x2f   :  { %509 = vmatpush.bf16.msrb.mxu1 %v763_v47 }
  0x32   :  { %497 = vmatpush.bf16.msrb.mxu0 %v754_v48 }
  0x33   :  { %510 = vmatpush.bf16.msrb.mxu1 %v762_v49 }
  0x36   :  { %498 = vmatpush.bf16.msrb.mxu0 %v753_v50 }
  0x37   :  { %511 = vmatpush.bf16.msrb.mxu1 %v761_v51 }
  0x3a   :  { %499 = vmatpush.bf16.msrb.mxu0 %v752_v52 }
  0x3b   :  { %512 = vmatpush.bf16.msrb.mxu1 %v760_v53 }
  0x3e   :  { %500 = vmatpush.bf16.msrb.mxu0 %v751_v54 }
  0x3f   :  { %513 = vmatpush.bf16.msrb.mxu1 %v759_v55 }
  0x42   :  { %501 = vmatpush.bf16.msrb.mxu0 %v750_v59 }
  0x43   :  { %514 = vmatpush.bf16.msrb.mxu1 %v758_v60 }
  0x45   :  { %502 = vmatmul.bf16.vlgmr.msrb.gmra.mxu0 %v146_v61 }
  0x46   :  { %515 = vmatmul.bf16.vlgmr.msrb.gmra.mxu1 %v147_v62 }
  0xa2   :  { %v451_v63 = vpop.f32.mrf.mxu0 }
  0xa3   :  { %v464_v0 = vpop.f32.mrf.mxu1  ;;  %v452_v6 = vadd.f32 %v769_v5, %v451_v63 }
  0xa5   :  { %v465_v9 = vadd.f32 %v464_v0, %v452_v6 }
  0xaa   :  { %v453_v1 = vpop.f32.mrf.mxu0  ;;  %v477_v3 = vpop.f32.mrf.mxu2 }
  0xab   :  { %v466_v2 = vpop.f32.mrf.mxu1  ;;  %v490_v4 = vpop.f32.mrf.mxu3  ;;  %v478_v10 = vadd.f32 %v477_v3, %v465_v9 }
  0xad   :  { %v491_v11 = vadd.f32 %v490_v4, %v478_v10 }
  0xb2   :  { %v479_v7 = vpop.f32.mrf.mxu2 }
  0xb3   :  { %v492_v8 = vpop.f32.mrf.mxu3 }
  0xc2   :  { %v503_v12 = vpop.f32.mrf.mxu0 }
  0xc3   :  { %v516_v13 = vpop.f32.mrf.mxu1  ;;  %v504_v14 = vadd.f32 %v503_v12, %v491_v11 }
  0xc5   :  { %v517_v15 = vadd.f32 %v516_v13, %v504_v14 }
  0xc7   :  { %520 = vst [vmem:[%s840_s3] sm:$0xff] %v517_v15 }
  0xca   :  { %v505_v16 = vpop.f32.mrf.mxu0 }
  0xcb   :  { %v518_v17 = vpop.f32.mrf.mxu1 }
  0xcc   :  { %525 = vsyncpa [#allocation3], 1 }

</bundles_post_ra>
